<compile_context>
chip_gen: v7x
topology: tpu7x:2x2x1
jax: 0.10.0
libtpu: 0.0.40
codegen_flags: <defaults>
</compile_context>

<pallas_src>
import jax
import jax.numpy as jnp
from jax.experimental import pallas as pl
from jax.experimental.pallas import tpu as pltpu


# ----------------------------------------------------------------------------
# In-kernel exact GELU.  PyTorch nn.GELU() default is the erf-based (exact) GELU,
# so erf is evaluated with the Abramowitz & Stegun 7.1.26 polynomial
# (|err| <= 1.5e-7), which lowers to plain VPU ops + one EUP exp — no erf
# primitive required from Mosaic.
# ----------------------------------------------------------------------------
def _erf(x):
    a1 = 0.254829592
    a2 = -0.284496736
    a3 = 1.421413741
    a4 = -1.453152027
    a5 = 1.061405429
    p = 0.3275911
    s = jnp.where(x < 0.0, -1.0, 1.0)
    ax = x * s
    t = 1.0 / (1.0 + p * ax)
    poly = ((((a5 * t + a4) * t + a3) * t + a2) * t + a1) * t
    return s * (1.0 - poly * jnp.exp(-ax * ax))


def _gelu_exact(x):
    return 0.5 * x * (1.0 + _erf(x * 0.7071067811865476))


# ----------------------------------------------------------------------------
# Fused MLP kernel:  out = gelu(x @ W1 + b1) @ W2 + b2
# ----------------------------------------------------------------------------
def _pmlp_kernel(x_ref, w1_ref, b1_ref, w2_ref, b2_ref, o_ref):
    # x: [tm, K], w1: [K, H], b1: [1, H], w2: [H, O], b2: [1, O], o: [tm, O]
    h = jnp.dot(x_ref[...], w1_ref[...], preferred_element_type=jnp.float32) + b1_ref[...]
    h = _gelu_exact(h)
    o_ref[...] = (
        jnp.dot(h, w2_ref[...], preferred_element_type=jnp.float32) + b2_ref[...]
    ).astype(o_ref.dtype)


def pmlp_forward(x, params, *, tile_m=128):
    B, K = x.shape
    w1, b1, w2, b2 = params["w1"], params["b1"], params["w2"], params["b2"]
    H = w1.shape[1]
    O = w2.shape[1]
    # M-tile: divide the batch evenly (fallback = whole batch in one block, which
    # always satisfies the (8,128) rule since it equals the full array dim).
    if B % tile_m != 0 or tile_m > B:
        tile_m = B
    grid = (B // tile_m,)
    return pl.pallas_call(
        _pmlp_kernel,
        out_shape=jax.ShapeDtypeStruct((B, O), x.dtype),
        grid=grid,
        in_specs=[
            pl.BlockSpec((tile_m, K), lambda i: (i, 0)),   # x tile
            pl.BlockSpec((K, H), lambda i: (0, 0)),        # W1 (pinned)
            pl.BlockSpec((1, H), lambda i: (0, 0)),        # b1 (pinned)
            pl.BlockSpec((H, O), lambda i: (0, 0)),        # W2 (pinned)
            pl.BlockSpec((1, O), lambda i: (0, 0)),        # b2 (pinned)
        ],
        out_specs=pl.BlockSpec((tile_m, O), lambda i: (i, 0)),
        compiler_params=pltpu.CompilerParams(dimension_semantics=("parallel",)),
    )(x, w1, b1, w2, b2)


# ----------------------------------------------------------------------------
# Parameters (deterministic, PyTorch nn.Linear default init), pre-laid-out:
# weights stored as [in, out], biases as [1, out] — no per-call transposes.
# ----------------------------------------------------------------------------
def init_params(key, layers=(4, 64, 128), num_classes=5):
    def linear(k, fan_in, fan_out):
        kw, kb = jax.random.split(k)
        bound = 1.0 / (fan_in ** 0.5)
        w = jax.random.uniform(kw, (fan_in, fan_out), jnp.float32, -bound, bound)
        b = jax.random.uniform(kb, (1, fan_out), jnp.float32, -bound, bound)
        return w, b

    k1, k2, k3 = jax.random.split(key, 3)
    w1, b1 = linear(k1, layers[0], layers[1])
    w2, b2 = linear(k2, layers[1], layers[2])
    # TODO(synk): classifier head is defined in the PyTorch module but unused by
    # forward(); params kept for parity only.
    wc, bc = linear(k3, layers[2], num_classes)
    return dict(w1=w1, b1=b1, w2=w2, b2=b2, cls_w=wc, cls_b=bc)


def pmlp_reference(x, params):
    h = x @ params["w1"] + params["b1"]
    h = jax.nn.gelu(h, approximate=False)   # exact (erf) GELU == nn.GELU() default
    return h @ params["w2"] + params["b2"]


# ----------------------------------------------------------------------------
if __name__ == "__main__":
    key = jax.random.PRNGKey(0)
    kx, kp = jax.random.split(key)
    B, IN = 256, 4                      # input feature dim = layers[0] = 4
    x = jax.random.normal(kx, (B, IN), jnp.float32)
    params = init_params(kp, layers=(4, 64, 128), num_classes=5)

    fwd = jax.jit(pmlp_forward)
    out = fwd(x, params)
    jax.block_until_ready(out)

    assert out.shape == (B, 128), out.shape
    ref = pmlp_reference(x, params)
    err = float(jnp.max(jnp.abs(out - ref)))
    assert err < 1e-2, f"max abs err vs reference: {err}"
    print("KERNEL_OK")
</pallas_src>

<mosaic_0001>
module attributes {stable_mosaic.version = 11 : i64} {
  func.func @_pmlp_kernel(%arg0: i32, %arg1: memref<128x4xf32, #tpu.memory_space<vmem>>, %arg2: memref<4x64xf32, #tpu.memory_space<vmem>>, %arg3: memref<1x64xf32, #tpu.memory_space<vmem>>, %arg4: memref<64x128xf32, #tpu.memory_space<vmem>>, %arg5: memref<1x128xf32, #tpu.memory_space<vmem>>, %arg6: memref<128x128xf32, #tpu.memory_space<vmem>>) attributes {dimension_semantics = [#tpu.dimension_semantics<parallel>], iteration_bounds = array<i64: 2>, scalar_prefetch = 0 : i64, scratch_operands = 0 : i64, tpu.core_type = #tpu.core_type<tc>, window_params = [{transform_indices = @transform_0, window_bounds = array<i64: 128, 4>}, {pipeline_mode = #tpu.pipeline_mode<synchronous>, transform_indices = @transform_1, window_bounds = array<i64: 4, 64>}, {pipeline_mode = #tpu.pipeline_mode<synchronous>, transform_indices = @transform_2, window_bounds = array<i64: 1, 64>}, {pipeline_mode = #tpu.pipeline_mode<synchronous>, transform_indices = @transform_3, window_bounds = array<i64: 64, 128>}, {pipeline_mode = #tpu.pipeline_mode<synchronous>, transform_indices = @transform_4, window_bounds = array<i64: 1, 128>}, {transform_indices = @transform_5, window_bounds = array<i64: 128, 128>}]} {
    %c0 = arith.constant 0 : index
    %c0_0 = arith.constant 0 : index
    %0 = vector.load %arg1[%c0, %c0_0] : memref<128x4xf32, #tpu.memory_space<vmem>>, vector<128x4xf32>
    %c0_1 = arith.constant 0 : index
    %c0_2 = arith.constant 0 : index
    %1 = vector.load %arg2[%c0_1, %c0_2] : memref<4x64xf32, #tpu.memory_space<vmem>>, vector<4x64xf32>
    %cst = arith.constant dense<0.000000e+00> : vector<128x64xf32>
    %2 = tpu.matmul %0, %1, %cst {dimension_numbers = #tpu.dot_dimension_numbers<[1], [0], [0], [1], [0, 0, 1, 1], [], []>} : vector<128x4xf32>, vector<4x64xf32>, vector<128x64xf32> -> vector<128x64xf32>
    %c0_3 = arith.constant 0 : index
    %c0_4 = arith.constant 0 : index
    %3 = vector.load %arg3[%c0_3, %c0_4] : memref<1x64xf32, #tpu.memory_space<vmem>>, vector<1x64xf32>
    %4 = vector.broadcast %3 : vector<1x64xf32> to vector<128x64xf32>
    %5 = arith.addf %2, %4 : vector<128x64xf32>
    %cst_5 = arith.constant 5.000000e-01 : f32
    %6 = vector.broadcast %cst_5 : f32 to vector<128x64xf32>
    %7 = arith.mulf %6, %5 : vector<128x64xf32>
    %cst_6 = arith.constant 0.707106769 : f32
    %8 = vector.broadcast %cst_6 : f32 to vector<128x64xf32>
    %9 = arith.mulf %5, %8 : vector<128x64xf32>
    %cst_7 = arith.constant 0.000000e+00 : f32
    %10 = vector.broadcast %cst_7 : f32 to vector<128x64xf32>
    %11 = arith.cmpf olt, %9, %10 : vector<128x64xf32>
    %cst_8 = arith.constant -1.000000e+00 : f32
    %cst_9 = arith.constant 1.000000e+00 : f32
    %12 = vector.broadcast %cst_8 : f32 to vector<128x64xf32>
    %13 = vector.broadcast %cst_9 : f32 to vector<128x64xf32>
    %14 = arith.select %11, %12, %13 : vector<128x64xi1>, vector<128x64xf32>
    %15 = arith.mulf %9, %14 : vector<128x64xf32>
    %cst_10 = arith.constant 0.327591091 : f32
    %16 = vector.broadcast %cst_10 : f32 to vector<128x64xf32>
    %17 = arith.mulf %16, %15 : vector<128x64xf32>
    %cst_11 = arith.constant 1.000000e+00 : f32
    %18 = vector.broadcast %cst_11 : f32 to vector<128x64xf32>
    %19 = arith.addf %18, %17 : vector<128x64xf32>
    %cst_12 = arith.constant 1.000000e+00 : f32
    %20 = vector.broadcast %cst_12 : f32 to vector<128x64xf32>
    %21 = arith.divf %20, %19 : vector<128x64xf32>
    %cst_13 = arith.constant 1.06140542 : f32
    %22 = vector.broadcast %cst_13 : f32 to vector<128x64xf32>
    %23 = arith.mulf %22, %21 : vector<128x64xf32>
    %cst_14 = arith.constant -1.45315206 : f32
    %24 = vector.broadcast %cst_14 : f32 to vector<128x64xf32>
    %25 = arith.addf %23, %24 : vector<128x64xf32>
    %26 = arith.mulf %25, %21 : vector<128x64xf32>
    %cst_15 = arith.constant 1.42141378 : f32
    %27 = vector.broadcast %cst_15 : f32 to vector<128x64xf32>
    %28 = arith.addf %26, %27 : vector<128x64xf32>
    %29 = arith.mulf %28, %21 : vector<128x64xf32>
    %cst_16 = arith.constant -0.284496725 : f32
    %30 = vector.broadcast %cst_16 : f32 to vector<128x64xf32>
    %31 = arith.addf %29, %30 : vector<128x64xf32>
    %32 = arith.mulf %31, %21 : vector<128x64xf32>
    %cst_17 = arith.constant 0.254829586 : f32
    %33 = vector.broadcast %cst_17 : f32 to vector<128x64xf32>
    %34 = arith.addf %32, %33 : vector<128x64xf32>
    %35 = arith.mulf %34, %21 : vector<128x64xf32>
    %cst_18 = arith.constant 0.000000e+00 : f32
    %36 = vector.broadcast %cst_18 : f32 to vector<128x64xf32>
    %37 = arith.subf %36, %15 : vector<128x64xf32>
    %38 = arith.mulf %37, %15 : vector<128x64xf32>
    %39 = math.exp %38 : vector<128x64xf32>
    %40 = arith.mulf %35, %39 : vector<128x64xf32>
    %cst_19 = arith.constant 1.000000e+00 : f32
    %41 = vector.broadcast %cst_19 : f32 to vector<128x64xf32>
    %42 = arith.subf %41, %40 : vector<128x64xf32>
    %43 = arith.mulf %14, %42 : vector<128x64xf32>
    %cst_20 = arith.constant 1.000000e+00 : f32
    %44 = vector.broadcast %cst_20 : f32 to vector<128x64xf32>
    %45 = arith.addf %44, %43 : vector<128x64xf32>
    %46 = arith.mulf %7, %45 : vector<128x64xf32>
    %c0_21 = arith.constant 0 : index
    %c0_22 = arith.constant 0 : index
    %47 = vector.load %arg4[%c0_21, %c0_22] : memref<64x128xf32, #tpu.memory_space<vmem>>, vector<64x128xf32>
    %cst_23 = arith.constant dense<0.000000e+00> : vector<128x128xf32>
    %48 = tpu.matmul %46, %47, %cst_23 {dimension_numbers = #tpu.dot_dimension_numbers<[1], [0], [0], [1], [0, 0, 1, 1], [], []>} : vector<128x64xf32>, vector<64x128xf32>, vector<128x128xf32> -> vector<128x128xf32>
    %c0_24 = arith.constant 0 : index
    %c0_25 = arith.constant 0 : index
    %49 = vector.load %arg5[%c0_24, %c0_25] : memref<1x128xf32, #tpu.memory_space<vmem>>, vector<1x128xf32>
    %50 = vector.broadcast %49 : vector<1x128xf32> to vector<128x128xf32>
    %51 = arith.addf %48, %50 : vector<128x128xf32>
    %c0_26 = arith.constant 0 : index
    %c0_27 = arith.constant 0 : index
    %52 = vector.load %arg6[%c0_26, %c0_27] : memref<128x128xf32, #tpu.memory_space<vmem>>, vector<128x128xf32>
    tpu.vector_store %arg6[%c0_26, %c0_27], %51 {strides = array<i32>} : memref<128x128xf32, #tpu.memory_space<vmem>>, vector<128x128xf32>,
    return
  }
  func.func @transform_0(%arg0: i32) -> (i32, i32) {
    %c0_i32 = arith.constant 0 : i32
    %c0_i32_0 = arith.constant 0 : i32
    return %arg0, %c0_i32 : i32, i32
  }
  func.func @transform_1(%arg0: i32) -> (i32, i32) {
    %c0_i32 = arith.constant 0 : i32
    %c0_i32_0 = arith.constant 0 : i32
    %c0_i32_1 = arith.constant 0 : i32
    return %c0_i32, %c0_i32_0 : i32, i32
  }
  func.func @transform_2(%arg0: i32) -> (i32, i32) {
    %c0_i32 = arith.constant 0 : i32
    %c0_i32_0 = arith.constant 0 : i32
    %c0_i32_1 = arith.constant 0 : i32
    return %c0_i32, %c0_i32_0 : i32, i32
  }
  func.func @transform_3(%arg0: i32) -> (i32, i32) {
    %c0_i32 = arith.constant 0 : i32
    %c0_i32_0 = arith.constant 0 : i32
    %c0_i32_1 = arith.constant 0 : i32
    return %c0_i32, %c0_i32_0 : i32, i32
  }
  func.func @transform_4(%arg0: i32) -> (i32, i32) {
    %c0_i32 = arith.constant 0 : i32
    %c0_i32_0 = arith.constant 0 : i32
    %c0_i32_1 = arith.constant 0 : i32
    return %c0_i32, %c0_i32_0 : i32, i32
  }
  func.func @transform_5(%arg0: i32) -> (i32, i32) {
    %c0_i32 = arith.constant 0 : i32
    %c0_i32_0 = arith.constant 0 : i32
    return %arg0, %c0_i32 : i32, i32
  }
}

</mosaic_0001>

<bundles_post_ra>
// kernel: pmlp_forward.1
= control target key start
LH: loop header
LB: loop body
LE: loop exit
PB: predicated region body
PF: predicated region fallthrough
CT: control target
= control target key end

     0   :  { %10 = vsyncpa [#allocation3], 0  ;;  %s2154_s0 = inlined_call_operand.vmem [shape: f32[256,4], index: 0, kind: input, shape index: {}]   ;;  %s2155_s1 = inlined_call_operand.vmem [shape: f32[4,64], index: 1, kind: input, shape index: {}]   ;;  %s2156_s2 = inlined_call_operand.vmem [shape: f32[1,64], index: 2, kind: input, shape index: {}]   ;;  %s2157_s3 = inlined_call_operand.vmem [shape: f32[64,128], index: 3, kind: input, shape index: {}]   ;;  %s2158_s4 = inlined_call_operand.vmem [shape: f32[1,128], index: 4, kind: input, shape index: {}]   ;;  %s2159_s5 = inlined_call_operand.hbm [shape: f32[256,128], index: 5, kind: output, shape index: {}]  }
   0x1   :  { %12 = vsyncpa [#allocation3 + $0x1], 0  ;;  %s1564_s18 = smov 0   ;;  %s1566_s19 = smov 0  }
   0x2   :  { %s1568_s20 = smov 0   ;;  %s1570_s21 = smov 0  }
   0x3 LB: > { %s1585_s22 = sadd.s32 4294967295, %s1528_s21   ;;  %s1181_s23 = sadd.s32 4294967294, %s1528_s21   ;;  %s1528_s21 = sphi %s1570_s21, %s2174_s21   ;;  %s1524_s20 = sphi %s1568_s20, %s2173_s20   ;;  %s1520_s19 = sphi %s1566_s19, %s2172_s19   ;;  %s1516_s18 = sphi %s1564_s18, %s2171_s18  }
   0x4   : > { %s1589_s24 = sadd.s32 1, %s1528_s21   ;;  %s135_s25 = sadd.s32 1, %s1524_s20 }
   0x5   : > { %s132_s26 = ssub.s32 %s1528_s21, %s1589_s24  ;;  %p145_p0 = scmp.ne.s32.totalorder %s1524_s20, %s1520_s19 }
   0x6   : > { %p133_p1 = scmp.eq.s32.totalorder %s132_s26, 0  ;;  %p146_p2 = scmp.eq.s32.totalorder %s1585_s22, 1 }
   0x7   : > { %p151_p3 = scmp.ne.s32.totalorder %s1520_s19, %s1516_s18  ;;  %p152_p4 = scmp.eq.s32.totalorder %s1181_s23, 1 }
   0x8   : > { %s1600_s27 = scalar_select %p133_p1, %s1524_s20, %s135_s25  }
   0x9   : > { %p1602_p5 = por %p146_p2, %p145_p0  ;;  %p1606_p6 = por %p152_p4, %p151_p3 }
   0xa   : > { %p1184_p7 = scmp.ge.s32.totalorder %s1528_s21, 1  ;;  %p191_p8 = scmp.lt.s32.totalorder %s1528_s21, 3 }
   0xc   : > { %p192_p9 = pnand %p1184_p7, %p191_p8 }
   0xe   : > { %195 = sbr.rel (%p192_p9) target bundleno = 603 (0x25b), region = 40 }
  0x15   : > { %v242_v0 = vld [vmem:[%s2155_s1] sm:$0xf]  ;;  %vm299_vm0 = vcmask 1043456   ;;  %s1186_s7 = sshll.u32 %s1585_s22, 4  ;;  %vm250_vm1 = vcmask 31744   ;;  %v881_v18 = vld [vmem:[%s2157_s3 + $0x8] sm:$0xff] }
  0x16   : > { %1270 = vmatprep.subr.msk.mxu0 %vm299_vm0, %v242_v0  ;;  %p220_p10 = scmp.lt.s32.totalorder %s1186_s7, 31  ;;  %v880_v17 = vld [vmem:[%s2157_s3] sm:$0xff]  ;;  %v882_v20 = vld [vmem:[%s2157_s3 + $0x10] sm:$0xff]  ;;  %v883_v21 = vld [vmem:[%s2157_s3 + $0x18] sm:$0xff]  ;;  %v1530_v39 = vmov 1.0   ;;  %vm895_vm12 = vcmask 523264  }
  0x17   : > { %1271 = vmatpush3.msk.msra.mxu0 %vm299_vm0, %v242_v0  ;;  %v1336_v19 = vpack.c.bf16 %v881_v18, %v880_v17  ;;  %v1340_v22 = vpack.c.bf16 %v883_v21, %v882_v20  ;;  %v884_v23 = vld [vmem:[%s2157_s3 + $0x20] sm:$0xff]  ;;  %v885_v24 = vld [vmem:[%s2157_s3 + $0x28] sm:$0xff]  ;;  %v886_v26 = vld [vmem:[%s2157_s3 + $0x30] sm:$0xff]  ;;  %s216_s14 = sand.u32 1, %s1520_s19   ;;  %s1228_s25 = sshll.u32 %s1585_s22, 11 }
  0x18   : > { %s2176_s7 = smov (!%p220_p10, %s1186_s7), 31  ;;  %v1344_v25 = vpack.c.bf16 %v885_v24, %v884_v23  ;;  %v887_v27 = vld [vmem:[%s2157_s3 + $0x38] sm:$0xff]  ;;  %v1680_v29 = vld [vmem:[%s2156_s2] ss:$0 sm:$0xff]  ;;  %s1185_s15 = sshll.u32 %s216_s14, 7 }
  0x19   : > { %s1187_s8 = sshll.u32 %s2176_s7, 3  ;;  %1337 = vmatprep.subr.bf16.mxu0 %v1336_v19  ;;  %1352 = vmatprep.subr.bf16.mxu1 %v1336_v19  ;;  %v1348_v28 = vpack.c.bf16 %v887_v27, %v886_v26  ;;  %s2084_s23 = scalar_lea.vmem [#allocation2], %s1185_s15 }
  0x1a   : > { %s1619_s11 = scalar_lea.vmem %s2154_s0, %s1187_s8  ;;  %1356 = vmatpush3.bf16.msra.mxu1 %v1336_v19  ;;  %s1119_s26 = sshll.u32 %s2084_s23, 4  ;;  %s2107_s26 = int_to_ptr.vmem [resolvable:$true] %s1119_s26 }
  0x1b   : > { %v226_v1 = vld [vmem:[%s1619_s11] sm:$0xff]  ;;  %v227_v2 = vld [vmem:[%s1619_s11 + $0x8] sm:$0xff]  ;;  %v228_v3 = vld [vmem:[%s1619_s11 + $0x10] sm:$0xff]  ;;  %1353 = vmatprep.subr.bf16.mxu1 %v1340_v22  ;;  %s2105_s7 = scalar_lea.hbm %s2159_s5, %s1228_s25  ;;  %s2113_s22 = scalar_lea.sflag [#allocation3], %s216_s14 }
  0x1c   : > { %1272 = vmatprep.mubr.msk.f32.mxu0 %vm250_vm1, %v226_v1  ;;  %v229_v4 = vld [vmem:[%s1619_s11 + $0x18] sm:$0xff]  ;;  %v230_v5 = vld [vmem:[%s1619_s11 + $0x20] sm:$0xff]  ;;  %v231_v6 = vld [vmem:[%s1619_s11 + $0x28] sm:$0xff]  ;;  %s1466_s8 = scalar_lea.vmem %s2107_s26, 2048  ;;  %s1531_s9 = smov [#allocation2]  }
  0x1d   : > { %1273 = vmatmul.mubr.msk.f32.vlgmr.msra.gmra.mrb[0].mxu0 %vm250_vm1, %v227_v2  ;;  %v232_v7 = vld [vmem:[%s1619_s11 + $0x30] sm:$0xff]  ;;  %v233_v8 = vld [vmem:[%s1619_s11 + $0x38] sm:$0xff]  ;;  %v234_v9 = vld [vmem:[%s1619_s11 + $0x40] sm:$0xff]  ;;  %p1467_p11 = scmp.ne.s32.totalorder %s2107_s26, %s1466_s8  ;;  %s1470_s10 = sshll.u32 %s1531_s9, 4  ;;  %s1471_s10 = int_to_ptr.vmem [resolvable:$false] %s1470_s10 }
  0x1e   : > { %1275 = vmatprep.mubr.msk.f32.mxu0 %vm250_vm1, %v228_v3  ;;  %v235_v10 = vld [vmem:[%s1619_s11 + $0x48] sm:$0xff]  ;;  %v236_v11 = vld [vmem:[%s1619_s11 + $0x50] sm:$0xff]  ;;  %v237_v12 = vld [vmem:[%s1619_s11 + $0x58] sm:$0xff]  ;;  %1339 = vmatpush3.bf16.msra.mxu0 %v1336_v19  ;;  %p1473_p0 = scmp.lt.s32.totalorder %s2107_s26, %s1471_s10 }
  0x1f   : > { %v238_v13 = vld [vmem:[%s1619_s11 + $0x60] sm:$0xff]  ;;  %v239_v14 = vld [vmem:[%s1619_s11 + $0x68] sm:$0xff]  ;;  %v240_v15 = vld [vmem:[%s1619_s11 + $0x70] sm:$0xff]  ;;  %1341 = vmatprep.subr.bf16.mxu0 %v1340_v22  ;;  %1357 = vmatpush3.bf16.msra.mxu1 %v1340_v22  ;;  %p1468_p12 = pnand %p1467_p11, %p1602_p5 }
  0x20   : > { %v241_v16 = vld [vmem:[%s1619_s11 + $0x78] sm:$0xff]  ;;  %1354 = vmatprep.subr.bf16.mxu1 %v1344_v25  ;;  %s1472_s11 = scalar_lea.vmem %s1471_s10, 4096 }
  0x21   : > { %1276 = vmatmul.mubr.msk.f32.gmra.mrb[2].mxu0 %vm250_vm1, %v229_v4  ;;  %p1469_p13 = pneg %p1468_p12  ;;  %p1474_p1 = scmp.lt.s32.totalorder %s1472_s11, %s1466_s8 }
  0x22   : > { %1278 = vmatprep.mubr.msk.f32.mxu0 %vm250_vm1, %v230_v5  ;;  %1343 = vmatpush3.bf16.msra.mxu0 %v1340_v22 }
  0x23   : > { %1345 = vmatprep.subr.bf16.mxu0 %v1344_v25  ;;  %1358 = vmatpush3.bf16.msra.mxu1 %v1344_v25  ;;  %p1475_p2 = por %p1474_p1, %p1473_p0 }
  0x24   : > { %1355 = vmatprep.subr.bf16.mxu1 %v1348_v28 }
  0x25   : > { %1279 = vmatmul.mubr.msk.f32.gmra.mrb[4].mxu0 %vm250_vm1, %v231_v6  ;;  %p1476_p3 = pnand %p1475_p2, %p1469_p13 }
  0x26   : > { %1281 = vmatprep.mubr.msk.f32.mxu0 %vm250_vm1, %v232_v7  ;;  %1347 = vmatpush3.bf16.msra.mxu0 %v1344_v25 }
  0x27   : > { %1349 = vmatprep.subr.bf16.mxu0 %v1348_v28  ;;  %1359 = vmatpush3.bf16.msra.mxu1 %v1348_v28 }
  0x29   : > { %1282 = vmatmul.mubr.msk.f32.gmra.mrb[6].mxu0 %vm250_vm1, %v233_v8 }
  0x2a   : > { %1284 = vmatprep.mubr.msk.f32.mxu0 %vm250_vm1, %v234_v9  ;;  %1351 = vmatpush3.bf16.msra.mxu0 %v1348_v28 }
  0x2d   : > { %1285 = vmatmul.mubr.msk.f32.gmra.mrb[8].mxu0 %vm250_vm1, %v235_v10 }
  0x2e   : > { %1287 = vmatprep.mubr.msk.f32.mxu0 %vm250_vm1, %v236_v11 }
  0x31   : > { %1288 = vmatmul.mubr.msk.f32.gmra.mrb[10].mxu0 %vm250_vm1, %v237_v12 }
  0x32   : > { %1290 = vmatprep.mubr.msk.f32.mxu0 %vm250_vm1, %v238_v13 }
  0x35   : > { %1291 = vmatmul.mubr.msk.f32.gmra.mrb[12].mxu0 %vm250_vm1, %v239_v14 }
  0x36   : > { %1293 = vmatprep.mubr.msk.f32.mxu0 %vm250_vm1, %v240_v15 }
  0x39   : > { %1294 = vmatmul.mubr.msk.f32.gmra.mrb[14].mxu0 %vm250_vm1, %v241_v16 }
  0xf0   : > { %v1274_v30 = vpop.f32.mrb[0].mxu0 }
  0xf1   : > { %v1683_v31 = vadd.f32 %v1274_v30, %v1680_v29  ;;  %v369_v32 = vpop.f32.mrb[1].mxu0 }
  0xf2   : > { %v1686_v33 = vadd.f32 %v1680_v29, %v369_v32 }
  0xf3   : > { %v465_v34 = vmul.f32 0.70710677, %v1683_v31 }
  0xf4   : > { %v464_v35 = vmul.f32 0.70710677, %v1686_v33  ;;  %v1277_v36 = vpop.f32.mrb[2].mxu0 }
  0xf5   : > { %vm481_vm2 = vcmp.lt.f32.partialorder %v465_v34, 0.0  ;;  %v1691_v37 = vadd.f32 %v1277_v36, %v1680_v29  ;;  %v1693_v38 = vpop.f32.mrb[3].mxu0 }
  0xf6   : > { %v1696_v40 = vsel %vm481_vm2, -1.0, %v1530_v39  ;;  %vm480_vm3 = vcmp.lt.f32.partialorder %v464_v35, 0.0 }
  0xf7   : > { %v513_v41 = vmul.f32 %v1696_v40, %v465_v34  ;;  %v1700_v42 = vsel %vm480_vm3, -1.0, %v1530_v39  ;;  %v467_v43 = vmul.f32 0.70710677, %v1691_v37 }
  0xf8   : > { %v512_v44 = vmul.f32 %v1700_v42, %v464_v35  ;;  %v1280_v45 = vpop.f32.mrb[4].mxu0 }
  0xf9   : > { %v529_v46 = vmul.f32 0.3275911, %v513_v41  ;;  %vm483_vm4 = vcmp.lt.f32.partialorder %v467_v43, 0.0  ;;  %v389_v47 = vpop.f32.mrb[5].mxu0  ;;  %v1711_v52 = vadd.f32 %v1280_v45, %v1680_v29  ;;  %v737_v63 = vsub.f32 0.0, %v513_v41 }
  0xfa   : > { %v528_v48 = vmul.f32 0.3275911, %v512_v44  ;;  %v1705_v49 = vsel %vm483_vm4, -1.0, %v1530_v39  ;;  %v1716_v59 = vadd.f32 %v1680_v29, %v389_v47  ;;  %v736_v3 = vsub.f32 0.0, %v512_v44 }
  0xfb   : > { %v545_v50 = vadd.f32 1.0, %v529_v46  ;;  %v1708_v51 = vmul.f32 %v1705_v49, %v467_v43  ;;  %v469_v58 = vmul.f32 0.70710677, %v1711_v52  ;;  %v753_v9 = vmul.f32 %v737_v63, %v513_v41 }
  0xfc   : > { %v544_v53 = vadd.f32 1.0, %v528_v48  ;;  %v1283_v54 = vpop.f32.mrb[6].mxu0  ;;  %v468_v2 = vmul.f32 0.70710677, %v1716_v59  ;;  %v752_v18 = vmul.f32 %v736_v3, %v512_v44  ;;  %v1768_v45 = vadd.f32 %v1680_v29, %v1693_v38 }
  0xfd   : > { %1402 = vrcp.f32 %v545_v50  ;;  %v531_v55 = vmul.f32 0.3275911, %v1708_v51  ;;  %v399_v56 = vpop.f32.mrb[7].mxu0  ;;  %vm485_vm5 = vcmp.lt.f32.partialorder %v469_v58, 0.0  ;;  %v1719_v61 = vadd.f32 %v1283_v54, %v1680_v29 }
  0xfe   : > { %1404 = vrcp.f32 %v544_v53  ;;  %v1724_v0 = vsel %vm485_vm5, -1.0, %v1530_v39  ;;  %v1732_v5 = vadd.f32 %v1680_v29, %v399_v56  ;;  %vm484_vm6 = vcmp.lt.f32.partialorder %v468_v2, 0.0 }
  0xff   : > { %v547_v57 = vadd.f32 1.0, %v531_v55  ;;  %v1727_v1 = vmul.f32 %v1724_v0, %v469_v58  ;;  %v471_v4 = vmul.f32 0.70710677, %v1719_v61  ;;  %v1740_v10 = vsel %vm484_vm6, -1.0, %v1530_v39 }
 0x100   : > { %v1286_v60 = vpop.f32.mrb[8].mxu0  ;;  %v470_v11 = vmul.f32 0.70710677, %v1732_v5  ;;  %v1744_v14 = vmul.f32 %v1740_v10, %v468_v2  ;;  %v770_v24 = vmul.f32 1.442695, %v753_v9 }
 0x101   : > { %1406 = vrcp.f32 %v547_v57  ;;  %v1721_v62 = vpop.f32.mrb[9].mxu0  ;;  %v533_v7 = vmul.f32 0.3275911, %v1727_v1  ;;  %vm487_vm7 = vcmp.lt.f32.partialorder %v471_v4, 0.0  ;;  %v768_v35 = vmul.f32 1.442695, %v752_v18 }
 0x102   : > { %v1747_v15 = vsel %vm487_vm7, -1.0, %v1530_v39  ;;  %vm486_vm8 = vcmp.lt.f32.partialorder %v470_v11, 0.0  ;;  %v532_v22 = vmul.f32 0.3275911, %v1744_v14  ;;  %v1776_v54 = vadd.f32 %v1286_v60, %v1680_v29 }
 0x103   : > { %v549_v13 = vadd.f32 1.0, %v533_v7  ;;  %v1750_v19 = vmul.f32 %v1747_v15, %v471_v4  ;;  %v1759_v30 = vsel %vm486_vm8, -1.0, %v1530_v39  ;;  %v466_v38 = vmul.f32 0.70710677, %v1768_v45 }
 0x104   : > { %v1734_v6 = vpop.f32.mrb[10].mxu0  ;;  %v548_v28 = vadd.f32 1.0, %v532_v22  ;;  %v1771_v46 = vmul.f32 %v1759_v30, %v470_v11  ;;  %v473_v4 = vmul.f32 0.70710677, %v1776_v54  ;;  %v1786_v7 = vadd.f32 %v1680_v29, %v1721_v62 }
 0x105   : > { %v1737_v8 = vpop.f32.mrb[11].mxu0  ;;  %1408 = vrcp.f32 %v549_v13  ;;  %v535_v25 = vmul.f32 0.3275911, %v1750_v19  ;;  %vm482_vm9 = vcmp.lt.f32.partialorder %v466_v38, 0.0  ;;  %v739_v62 = vsub.f32 0.0, %v1708_v51 }
 0x106   : > { %1410 = vrcp.f32 %v548_v28  ;;  %v534_v57 = vmul.f32 0.3275911, %v1771_v46  ;;  %vm489_vm10 = vcmp.lt.f32.partialorder %v473_v4, 0.0 }
 0x107   : > { %v1403_v12 = vpop.eup %1402  ;;  %v551_v41 = vadd.f32 1.0, %v535_v25 }
 0x108   : > { %v1405_v16 = vpop.eup %1404  ;;  %v593_v17 = vmul.f32 1.0614054, %v1403_v12  ;;  %v1752_v20 = vpop.f32.mrb[12].mxu0  ;;  %v550_v13 = vadd.f32 1.0, %v534_v57  ;;  %v741_v57 = vsub.f32 0.0, %v1727_v1 }
 0x109   : > { %v592_v21 = vmul.f32 1.0614054, %v1405_v16  ;;  %v1761_v32 = vpop.f32.mrb[13].mxu0  ;;  %1412 = vrcp.f32 %v551_v41 }
 0x10a   : > { %v609_v23 = vadd.f32 -1.4531521, %v593_v17  ;;  %1414 = vpow2.f32 %v770_v24  ;;  %v472_v24 = vmul.f32 0.70710677, %v1786_v7 }
 0x10b   : > { %v1756_v26 = vpop.eup %1406  ;;  %v608_v27 = vadd.f32 -1.4531521, %v592_v21  ;;  %1416 = vpow2.f32 %v768_v35  ;;  %v1796_v35 = vsel %vm482_vm9, -1.0, %v1530_v39 }
 0x10c   : > { %v625_v34 = vmul.f32 %v1403_v12, %v609_v23  ;;  %v595_v36 = vmul.f32 1.0614054, %v1756_v26  ;;  %v1764_v43 = vpop.f32.mrb[14].mxu0  ;;  %1418 = vrcp.f32 %v550_v13  ;;  %vm488_vm11 = vcmp.lt.f32.partialorder %v472_v24, 0.0 }
 0x10d   : > { %v624_v44 = vmul.f32 %v1405_v16, %v608_v27  ;;  %v1773_v47 = vpop.f32.mrb[15].mxu0 }
 0x10e   : > { %v641_v48 = vadd.f32 1.4214138, %v625_v34  ;;  %v611_v50 = vadd.f32 -1.4531521, %v595_v36 }
 0x10f   : > { %v640_v53 = vadd.f32 1.4214138, %v624_v44  ;;  %v1781_v2 = vpop.eup %1408 }
 0x110   : > { %v657_v55 = vmul.f32 %v1403_v12, %v641_v48  ;;  %v627_v63 = vmul.f32 %v1756_v26, %v611_v50  ;;  %v597_v9 = vmul.f32 1.0614054, %v1781_v2  ;;  %v1789_v22 = vpop.eup %1410  ;;  %v1801_v50 = vsel %vm489_vm10, -1.0, %v1530_v39 }
 0x111   : > { %v656_v56 = vmul.f32 %v1405_v16, %v640_v53 }
 0x112   : > { %v673_v58 = vadd.f32 -0.28449672, %v657_v55  ;;  %v643_v18 = vadd.f32 1.4214138, %v627_v63  ;;  %v613_v21 = vadd.f32 -1.4531521, %v597_v9  ;;  %v514_v63 = vmul.f32 %v1796_v35, %v466_v38 }
 0x113   : > { %v672_v3 = vadd.f32 -0.28449672, %v656_v56  ;;  %v1792_v25 = vpop.eup %1412  ;;  %v755_v56 = vmul.f32 %v739_v62, %v1708_v51 }
 0x114   : > { %v689_v60 = vmul.f32 %v1403_v12, %v673_v58  ;;  %v1415_v28 = vpop.eup %1414  ;;  %v659_v44 = vmul.f32 %v1756_v26, %v643_v18  ;;  %v629_v48 = vmul.f32 %v1781_v2, %v613_v21  ;;  %v599_v55 = vmul.f32 1.0614054, %v1792_v25 }
 0x115   : > { %v688_v11 = vmul.f32 %v1405_v16, %v672_v3  ;;  %v1417_v36 = vpop.eup %1416  ;;  %v1809_v3 = vmul.f32 %v1801_v50, %v473_v4  ;;  %v448_v4 = vmul.f32 0.5, %v1686_v33 }
 0x116   : > { %v705_v17 = vadd.f32 0.2548296, %v689_v60  ;;  %v1813_v60 = vadd.f32 %v1734_v6, %v1680_v29  ;;  %v645_v13 = vadd.f32 1.4214138, %v629_v48  ;;  %v615_v21 = vadd.f32 -1.4531521, %v599_v55 }
 0x117   : > { %v704_v23 = vadd.f32 0.2548296, %v688_v11  ;;  %v675_v11 = vadd.f32 -0.28449672, %v659_v44  ;;  %v537_v62 = vmul.f32 0.3275911, %v1809_v3  ;;  %v1830_v44 = vpop.eup %1418 }
 0x118   : > { %v721_v27 = vmul.f32 %v1403_v12, %v705_v17  ;;  %v596_v12 = vmul.f32 1.0614054, %v1789_v22  ;;  %v1817_v17 = vsel %vm488_vm11, -1.0, %v1530_v39  ;;  %v631_v48 = vmul.f32 %v1792_v25, %v615_v21 }
 0x119   : > { %v720_v34 = vmul.f32 %v1405_v16, %v704_v23  ;;  %v774_v23 = vmul.f32 1.442695, %v755_v56  ;;  %v598_v21 = vmul.f32 1.0614054, %v1830_v44 }
 0x11a   : > { %v801_v41 = vmul.f32 %v1415_v28, %v721_v27  ;;  %v612_v18 = vadd.f32 -1.4531521, %v596_v12  ;;  %v757_v27 = vmul.f32 %v741_v57, %v1727_v1  ;;  %v475_v28 = vmul.f32 0.70710677, %v1813_v60 }
 0x11b   : > { %v800_v53 = vmul.f32 %v1417_v36, %v720_v34  ;;  %v449_v34 = vmul.f32 0.5, %v1683_v31  ;;  %v530_v36 = vmul.f32 0.3275911, %v514_v63  ;;  %1420 = vpow2.f32 %v774_v23 }
 0x11c   : > { %v817_v16 = vsub.f32 1.0, %v801_v41  ;;  %v661_v41 = vmul.f32 %v1781_v2, %v645_v13  ;;  %v628_v1 = vmul.f32 %v1789_v22, %v612_v18  ;;  %v738_v12 = vsub.f32 0.0, %v514_v63 }
 0x11d   : > { %v816_v58 = vsub.f32 1.0, %v800_v53  ;;  %v778_v55 = vmul.f32 1.442695, %v757_v27  ;;  %v740_v31 = vsub.f32 0.0, %v1744_v14  ;;  %vm491_vm13 = vcmp.lt.f32.partialorder %v475_v28, 0.0 }
 0x11e   : > { %v833_v9 = vmul.f32 %v817_v16, %v1696_v40  ;;  %v1824_v40 = vmul.f32 %v1817_v17, %v472_v24  ;;  %v553_v16 = vadd.f32 1.0, %v537_v62  ;;  %v647_v13 = vadd.f32 1.4214138, %v631_v48 }
 0x11f   : > { %v832_v51 = vmul.f32 %v816_v58, %v1700_v42  ;;  %v691_v42 = vmul.f32 %v1756_v26, %v675_v11  ;;  %v677_v58 = vadd.f32 -0.28449672, %v661_v41  ;;  %v644_v11 = vadd.f32 1.4214138, %v628_v1 }
 0x120   : > { %v849_v38 = vadd.f32 1.0, %v833_v9  ;;  %v536_v53 = vmul.f32 0.3275911, %v1824_v40  ;;  %v743_v9 = vsub.f32 0.0, %v1750_v19  ;;  %v546_v18 = vadd.f32 1.0, %v530_v36 }
 0x121   : > { %v848_v6 = vadd.f32 1.0, %v832_v51  ;;  %v707_v57 = vadd.f32 0.2548296, %v691_v42  ;;  %v1840_v51 = vsel %vm491_vm13, -1.0, %v1530_v39  ;;  %v693_v27 = vmul.f32 %v1781_v2, %v677_v58 }
 0x122   : > { %v865_v24 = vmul.f32 %v849_v38, %v449_v34  ;;  %v552_v56 = vadd.f32 1.0, %v536_v53  ;;  %v754_v38 = vmul.f32 %v738_v12, %v514_v63  ;;  %v1845_v23 = vmul.f32 %v1840_v51, %v475_v28 }
 0x123   : > { %v864_v33 = vmul.f32 %v848_v6, %v448_v4  ;;  %v756_v4 = vmul.f32 %v740_v31, %v1744_v14  ;;  %v759_v6 = vmul.f32 %v743_v9, %v1750_v19  ;;  %v742_v62 = vsub.f32 0.0, %v1771_v46 }
 0x124   : > { %1422 = vrcp.f32 %v552_v56  ;;  %v1852_v34 = vadd.f32 %v1680_v29, %v1737_v8  ;;  %v723_v42 = vmul.f32 %v1756_v26, %v707_v57  ;;  %v660_v63 = vmul.f32 %v1789_v22, %v644_v11 }
 0x125   : > { %1312 = vmatprep.mubr.msk.f32.mxu0 %vm895_vm12, %v864_v33  ;;  %1424 = vpow2.f32 %v778_v55  ;;  %v663_v14 = vmul.f32 %v1792_v25, %v647_v13  ;;  %v539_v36 = vmul.f32 0.3275911, %v1845_v23  ;;  %v1859_v28 = vmul.f32 0.5, %v1691_v37  ;;  %v1421_v53 = vpop.eup %1420 }
 0x126   : > { %1313 = vmatmul.mubr.msk.f32.vlgmr.msra.gmra.mrb[16].mxu0 %vm895_vm12, %v865_v24  ;;  %1426 = vrcp.f32 %v553_v16  ;;  %v1862_v41 = vmul.f32 0.5, %v1768_v45  ;;  %v1865_v19 = vmul.f32 0.5, %v1711_v52  ;;  %v614_v33 = vadd.f32 -1.4531521, %v598_v21 }
 0x127   : > { %v772_v8 = vmul.f32 1.442695, %v754_v38  ;;  %v1868_v1 = vmul.f32 0.5, %v1716_v59  ;;  %v776_v26 = vmul.f32 1.442695, %v756_v4  ;;  %v555_v48 = vadd.f32 1.0, %v539_v36 }
 0x128   : > { %1428 = vrcp.f32 %v546_v18  ;;  %v709_v24 = vadd.f32 0.2548296, %v693_v27  ;;  %v782_v12 = vmul.f32 1.442695, %v759_v6  ;;  %v474_v37 = vmul.f32 0.70710677, %v1852_v34 }
 0x129   : > { %v803_v55 = vmul.f32 %v1421_v53, %v723_v42  ;;  %v676_v31 = vadd.f32 -0.28449672, %v660_v63  ;;  %v679_v45 = vadd.f32 -0.28449672, %v663_v14  ;;  %v758_v16 = vmul.f32 %v742_v62, %v1771_v46 }
 0x12a   : > { %v630_v52 = vmul.f32 %v1830_v44, %v614_v33  ;;  %1430 = vrcp.f32 %v555_v48  ;;  %vm490_vm14 = vcmp.lt.f32.partialorder %v474_v37, 0.0  ;;  %v1875_v59 = vadd.f32 %v1752_v20, %v1680_v29 }
 0x12b   : > { %1432 = vpow2.f32 %v772_v8  ;;  %v1880_v57 = vmul.f32 0.5, %v1732_v5  ;;  %v745_v58 = vsub.f32 0.0, %v1809_v3  ;;  %v1884_v9 = vsel %vm490_vm14, -1.0, %v1530_v39 }
 0x12c   : > { %2165 = vst [vmem:[#allocation5_spill] sm:$0xff] %v1875_v59  ;;  %v725_v11 = vmul.f32 %v1781_v2, %v709_v24  ;;  %1434 = vpow2.f32 %v776_v26  ;;  %v1889_v20 = vmul.f32 %v1884_v9, %v474_v37  ;;  %v692_v21 = vmul.f32 %v1789_v22, %v676_v31 }
 0x12d   : > { %1436 = vpow2.f32 %v782_v12  ;;  %v780_v5 = vmul.f32 1.442695, %v758_v16  ;;  %v477_v38 = vmul.f32 0.70710677, %v1875_v59  ;;  %v819_v4 = vsub.f32 1.0, %v803_v55 }
 0x12e   : > { %v1877_v56 = vpop.eup %1422  ;;  %v695_v27 = vmul.f32 %v1792_v25, %v679_v45  ;;  %v646_v6 = vadd.f32 1.4214138, %v630_v52  ;;  %v538_v2 = vmul.f32 0.3275911, %v1889_v20  ;;  %v761_v62 = vmul.f32 %v745_v58, %v1809_v3 }
 0x12f   : > { %v1425_v46 = vpop.eup %1424  ;;  %v600_v13 = vmul.f32 1.0614054, %v1877_v56  ;;  %v744_v42 = vsub.f32 0.0, %v1824_v40  ;;  %vm493_vm15 = vcmp.lt.f32.partialorder %v477_v38, 0.0  ;;  %v1901_v63 = vadd.f32 %v1680_v29, %v1761_v32 }
 0x130   : > { %v1891_v18 = vpop.eup %1426  ;;  %v805_v14 = vmul.f32 %v1425_v46, %v725_v11  ;;  %v554_v8 = vadd.f32 1.0, %v538_v2  ;;  %v708_v26 = vadd.f32 0.2548296, %v692_v21  ;;  %v1905_v48 = vsel %vm493_vm15, -1.0, %v1530_v39 }
 0x131   : > { %v601_v36 = vmul.f32 1.0614054, %v1891_v18  ;;  %v616_v33 = vadd.f32 -1.4531521, %v600_v13  ;;  %v476_v53 = vmul.f32 0.70710677, %v1901_v63  ;;  %v1910_v3 = vadd.f32 %v1764_v43, %v1680_v29 }
 0x132   : > { %v1912_v24 = vpop.eup %1428  ;;  %v835_v32 = vmul.f32 %v819_v4, %v1705_v49  ;;  %v711_v12 = vadd.f32 0.2548296, %v695_v27  ;;  %v662_v37 = vmul.f32 %v1830_v44, %v646_v6  ;;  %1438 = vrcp.f32 %v554_v8 }
 0x133   : > { %2166 = vst [vmem:[#allocation6_spill] sm:$0xff] %v1910_v3  ;;  %1440 = vpow2.f32 %v780_v5  ;;  %v760_v55 = vmul.f32 %v744_v42, %v1824_v40  ;;  %v1918_v31 = vmul.f32 %v1905_v48, %v477_v38  ;;  %vm492_vm0 = vcmp.lt.f32.partialorder %v476_v53, 0.0 }
 0x134   : > { %v1920_v45 = vpop.eup %1430  ;;  %v821_v16 = vsub.f32 1.0, %v805_v14  ;;  %v617_v43 = vadd.f32 -1.4531521, %v601_v36  ;;  %v786_v52 = vmul.f32 1.442695, %v761_v62  ;;  %v632_v58 = vmul.f32 %v1877_v56, %v616_v33 }
 0x135   : > { %v1923_v46 = vpop.eup %1432  ;;  %v724_v49 = vmul.f32 %v1789_v22, %v708_v26  ;;  %v541_v11 = vmul.f32 0.3275911, %v1918_v31  ;;  %v1928_v13 = vsel %vm492_vm0, -1.0, %v1530_v39  ;;  %v479_v40 = vmul.f32 0.70710677, %v1910_v3 }
 0x136   : > { %v1435_v21 = vpop.eup %1434  ;;  %v851_v5 = vadd.f32 1.0, %v835_v32  ;;  %v727_v38 = vmul.f32 %v1792_v25, %v711_v12  ;;  %v678_v4 = vadd.f32 -0.28449672, %v662_v37  ;;  %v1933_v27 = vmul.f32 %v1928_v13, %v476_v53 }
 0x137   : > { %v1437_v6 = vpop.eup %1436  ;;  %v784_v2 = vmul.f32 1.442695, %v760_v55  ;;  %v603_v62 = vmul.f32 1.0614054, %v1920_v45  ;;  %v557_v22 = vadd.f32 1.0, %v541_v11  ;;  %vm495_vm1 = vcmp.lt.f32.partialorder %v479_v40, 0.0 }
 0x138   : > { %v633_v42 = vmul.f32 %v1891_v18, %v617_v43  ;;  %1442 = vpow2.f32 %v786_v52  ;;  %v648_v14 = vadd.f32 1.4214138, %v632_v58  ;;  %v540_v36 = vmul.f32 0.3275911, %v1933_v27 }
 0x139   : > { %v837_v33 = vmul.f32 %v821_v16, %v1724_v0  ;;  %v804_v8 = vmul.f32 %v1435_v21, %v724_v49  ;;  %1444 = vrcp.f32 %v557_v22  ;;  %v1940_v25 = vsel %vm495_vm1, -1.0, %v1530_v39 }
 0x13a   : > { %v807_v26 = vmul.f32 %v1437_v6, %v727_v38  ;;  %v694_v53 = vmul.f32 %v1830_v44, %v678_v4  ;;  %v556_v32 = vadd.f32 1.0, %v540_v36  ;;  %v1945_v12 = vadd.f32 %v1680_v29, %v1773_v47 }
 0x13b   : > { %v1948_v37 = vmul.f32 %v851_v5, %v1859_v28  ;;  %1446 = vpow2.f32 %v784_v2  ;;  %v619_v55 = vadd.f32 -1.4531521, %v603_v62  ;;  %v1951_v0 = vmul.f32 %v1940_v25, %v479_v40 }
 0x13c   : > { %2167 = vst [vmem:[#allocation7_spill] sm:$0xff] %v1945_v12  ;;  %v1953_v16 = vpop.eup %1438  ;;  %v649_v43 = vadd.f32 1.4214138, %v633_v42  ;;  %v664_v52 = vmul.f32 %v1877_v56, %v648_v14  ;;  %v747_v58 = vsub.f32 0.0, %v1845_v23  ;;  %1448 = vrcp.f32 %v556_v32 }
 0x13d   : > { %v1441_v49 = vpop.eup %1440  ;;  %v1957_v11 = vadd.f32 1.0, %v837_v33  ;;  %v820_v29 = vsub.f32 1.0, %v804_v8  ;;  %v602_v47 = vmul.f32 1.0614054, %v1953_v16  ;;  %v543_v28 = vmul.f32 0.3275911, %v1951_v0 }
 0x13e   : > { %v823_v21 = vsub.f32 1.0, %v807_v26  ;;  %v710_v5 = vadd.f32 0.2548296, %v694_v53  ;;  %v746_v40 = vsub.f32 0.0, %v1889_v20  ;;  %v478_v38 = vmul.f32 0.70710677, %v1945_v12 }
 0x13f   : > { %v635_v4 = vmul.f32 %v1920_v45, %v619_v55  ;;  %v618_v6 = vadd.f32 -1.4531521, %v602_v47  ;;  %v559_v2 = vadd.f32 1.0, %v543_v28  ;;  %v594_v62 = vmul.f32 1.0614054, %v1912_v24 }
 0x140   : > { %v665_v22 = vmul.f32 %v1891_v18, %v649_v43  ;;  %v680_v42 = vadd.f32 -0.28449672, %v664_v52  ;;  %v763_v14 = vmul.f32 %v747_v58, %v1845_v23  ;;  %vm494_vm2 = vcmp.lt.f32.partialorder %v478_v38, 0.0 }
 0x141   : > { %v634_v36 = vmul.f32 %v1953_v16, %v618_v6  ;;  %1450 = vrcp.f32 %v559_v2  ;;  %v1969_v33 = vsel %vm494_vm2, -1.0, %v1530_v39  ;;  %v610_v8 = vadd.f32 -1.4531521, %v594_v62 }
 0x142   : > { %v1971_v26 = vpop.eup %1442  ;;  %v836_v53 = vmul.f32 %v820_v29, %v1740_v10  ;;  %v762_v32 = vmul.f32 %v746_v40, %v1889_v20  ;;  %v748_v55 = vsub.f32 0.0, %v1933_v27  ;;  %v1977_v43 = vmul.f32 %v1969_v33, %v478_v38 }
 0x143   : > { %v1979_v23 = vpop.eup %1444  ;;  %v1982_v52 = vmul.f32 %v823_v21, %v1747_v15  ;;  %v651_v58 = vadd.f32 1.4214138, %v635_v4  ;;  %v650_v39 = vadd.f32 1.4214138, %v634_v36  ;;  %v626_v47 = vmul.f32 %v1912_v24, %v610_v8 }
 0x144   : > { %v726_v28 = vmul.f32 %v1830_v44, %v710_v5  ;;  %v681_v6 = vadd.f32 -0.28449672, %v665_v22  ;;  %v605_v10 = vmul.f32 1.0614054, %v1979_v23  ;;  %v749_v20 = vsub.f32 0.0, %v1918_v31 }
 0x145   : > { %v1447_v29 = vpop.eup %1446  ;;  %v696_v40 = vmul.f32 %v1877_v56, %v680_v42  ;;  %v666_v38 = vmul.f32 %v1953_v16, %v650_v39  ;;  %v542_v2 = vmul.f32 0.3275911, %v1977_v43  ;;  %v642_v15 = vadd.f32 1.4214138, %v626_v47 }
 0x146   : > { %v1991_v21 = vpop.eup %1448  ;;  %v790_v4 = vmul.f32 1.442695, %v763_v14  ;;  %v788_v62 = vmul.f32 1.442695, %v762_v32  ;;  %v621_v36 = vadd.f32 -1.4531521, %v605_v10  ;;  %v764_v44 = vmul.f32 %v748_v55, %v1933_v27 }
 0x147   : > { %v667_v5 = vmul.f32 %v1920_v45, %v651_v58  ;;  %v682_v22 = vadd.f32 -0.28449672, %v666_v38  ;;  %v604_v8 = vmul.f32 1.0614054, %v1991_v21  ;;  %v558_v3 = vadd.f32 1.0, %v542_v2 }
 0x148   : > { %v1996_v59 = vadd.f32 1.0, %v836_v53  ;;  %v697_v42 = vmul.f32 %v1891_v18, %v681_v6  ;;  %v637_v39 = vmul.f32 %v1979_v23, %v621_v36  ;;  %v658_v47 = vmul.f32 %v1912_v24, %v642_v15 }
 0x149   : > { %v712_v12 = vadd.f32 0.2548296, %v696_v40  ;;  %v765_v14 = vmul.f32 %v749_v20, %v1918_v31  ;;  %v620_v32 = vadd.f32 -1.4531521, %v604_v8  ;;  %1452 = vrcp.f32 %v558_v3 }
 0x14a   : > { %v698_v27 = vmul.f32 %v1953_v16, %v682_v22  ;;  %v653_v55 = vadd.f32 1.4214138, %v637_v39  ;;  %v792_v58 = vmul.f32 1.442695, %v764_v44  ;;  %v674_v10 = vadd.f32 -0.28449672, %v658_v47 }
 0x14b   : > { %v2003_v38 = vpop.eup %1450  ;;  %v806_v53 = vmul.f32 %v1441_v49, %v726_v28  ;;  %v683_v2 = vadd.f32 -0.28449672, %v667_v5  ;;  %1454 = vpow2.f32 %v788_v62  ;;  %v636_v6 = vmul.f32 %v1991_v21, %v620_v32 }
 0x14c   : > { %v669_v36 = vmul.f32 %v1979_v23, %v653_v55  ;;  %v607_v40 = vmul.f32 1.0614054, %v2003_v38  ;;  %v751_v31 = vsub.f32 0.0, %v1951_v0  ;;  %v690_v3 = vmul.f32 %v1912_v24, %v674_v10 }
 0x14d   : > { %v713_v20 = vadd.f32 0.2548296, %v697_v42  ;;  %v728_v15 = vmul.f32 %v1877_v56, %v712_v12  ;;  %v794_v44 = vmul.f32 1.442695, %v765_v14  ;;  %v652_v22 = vadd.f32 1.4214138, %v636_v6 }
 0x14e   : > { %v714_v8 = vadd.f32 0.2548296, %v698_v27  ;;  %1456 = vpow2.f32 %v792_v58  ;;  %v623_v49 = vadd.f32 -1.4531521, %v607_v40  ;;  %v706_v28 = vadd.f32 0.2548296, %v690_v3 }
 0x14f   : > { %v699_v62 = vmul.f32 %v1920_v45, %v683_v2  ;;  %v685_v5 = vadd.f32 -0.28449672, %v669_v36  ;;  %v668_v39 = vmul.f32 %v1991_v21, %v652_v22  ;;  %v750_v47 = vsub.f32 0.0, %v1977_v43 }
 0x150   : > { %1458 = vpow2.f32 %v790_v4  ;;  %v639_v32 = vmul.f32 %v2003_v38, %v623_v49  ;;  %v767_v42 = vmul.f32 %v751_v31, %v1951_v0  ;;  %v722_v56 = vmul.f32 %v1912_v24, %v706_v28 }
 0x151   : > { %v822_v12 = vsub.f32 1.0, %v806_v53  ;;  %v729_v14 = vmul.f32 %v1891_v18, %v713_v20  ;;  %v808_v27 = vmul.f32 %v1447_v29, %v728_v15  ;;  %v684_v55 = vadd.f32 -0.28449672, %v668_v39 }
 0x152   : > { %v730_v58 = vmul.f32 %v1953_v16, %v714_v8  ;;  %1460 = vpow2.f32 %v794_v44  ;;  %v655_v10 = vadd.f32 1.4214138, %v639_v32  ;;  %v802_v2 = vmul.f32 %v1923_v46, %v722_v56 }
 0x153   : > { %v2020_v6 = vpop.eup %1452  ;;  %v715_v4 = vadd.f32 0.2548296, %v699_v62  ;;  %v701_v36 = vmul.f32 %v1979_v23, %v685_v5  ;;  %v700_v0 = vmul.f32 %v1991_v21, %v684_v55  ;;  %v766_v24 = vmul.f32 %v750_v47, %v1977_v43 }
 0x154   : > { %v671_v53 = vmul.f32 %v2003_v38, %v655_v10  ;;  %v798_v18 = vmul.f32 1.442695, %v767_v42  ;;  %v606_v29 = vmul.f32 1.0614054, %v2020_v6  ;;  %v818_v40 = vsub.f32 1.0, %v802_v2 }
 0x155   : > { %v1455_v16 = vpop.eup %1454  ;;  %v838_v31 = vmul.f32 %v822_v12, %v1759_v30  ;;  %v809_v46 = vmul.f32 %v1971_v26, %v729_v14  ;;  %v824_v3 = vsub.f32 1.0, %v808_v27  ;;  %v716_v20 = vadd.f32 0.2548296, %v700_v0 }
 0x156   : > { %v810_v15 = vmul.f32 %v1455_v16, %v730_v58  ;;  %v687_v44 = vadd.f32 -0.28449672, %v671_v53  ;;  %v622_v22 = vadd.f32 -1.4531521, %v606_v29  ;;  %v834_v8 = vmul.f32 %v818_v40, %v1796_v35 }
 0x157   : > { %v731_v43 = vmul.f32 %v1920_v45, %v715_v4  ;;  %v717_v49 = vadd.f32 0.2548296, %v701_v36  ;;  %v732_v28 = vmul.f32 %v1991_v21, %v716_v20  ;;  %v796_v62 = vmul.f32 1.442695, %v766_v24 }
 0x158   : > { %v1457_v5 = vpop.eup %1456  ;;  %v703_v39 = vmul.f32 %v2003_v38, %v687_v44  ;;  %1462 = vpow2.f32 %v798_v18  ;;  %v638_v30 = vmul.f32 %v2020_v6, %v622_v22  ;;  %v850_v26 = vadd.f32 1.0, %v834_v8 }
 0x159   : > { %v868_v47 = vmul.f32 %v1996_v59, %v1868_v1  ;;  %v854_v32 = vadd.f32 1.0, %v838_v31  ;;  %v825_v42 = vsub.f32 1.0, %v809_v46  ;;  %v840_v35 = vmul.f32 %v824_v3, %v1817_v17 }
 0x15a   : > { %v1459_v56 = vpop.eup %1458  ;;  %v826_v45 = vsub.f32 1.0, %v810_v15  ;;  %v812_v12 = vmul.f32 %v1457_v5, %v732_v28  ;;  %v654_v14 = vadd.f32 1.4214138, %v638_v30  ;;  %v866_v21 = vmul.f32 %v850_v26, %v1862_v41 }
 0x15b   : > { %v811_v27 = vmul.f32 %v1459_v56, %v731_v43  ;;  %v733_v55 = vmul.f32 %v1979_v23, %v717_v49  ;;  %v719_v58 = vadd.f32 0.2548296, %v703_v39  ;;  %1464 = vpow2.f32 %v796_v62 }
 0x15c   : > { %v1461_v10 = vpop.eup %1460  ;;  %v670_v2 = vmul.f32 %v2020_v6, %v654_v14  ;;  %1315 = vmatprep.mubr.msk.f32.mxu1 %vm895_vm12, %v866_v21  ;;  %v869_v1 = vmul.f32 %v1957_v11, %v1865_v19  ;;  %v455_v17 = vmul.f32 0.5, %v1719_v61  ;;  %v855_v59 = vadd.f32 1.0, %v1982_v52 }
 0x15d   : > { %v870_v4 = vmul.f32 %v854_v32, %v1880_v57  ;;  %1316 = vmatmul.mubr.msk.f32.vlgmr.msra.gmra.mrb[0].mxu1 %vm895_vm12, %v1948_v37  ;;  %v856_v41 = vadd.f32 1.0, %v840_v35  ;;  %v842_v23 = vmul.f32 %v826_v45, %v1884_v9  ;;  %v828_v36 = vsub.f32 1.0, %v812_v12 }
 0x15e   : > { %v686_v0 = vadd.f32 -0.28449672, %v670_v2  ;;  %1318 = vmatprep.mubr.msk.f32.mxu1 %vm895_vm12, %v868_v47  ;;  %v841_v24 = vmul.f32 %v825_v42, %v1801_v50  ;;  %v827_v53 = vsub.f32 1.0, %v811_v27  ;;  %v813_v19 = vmul.f32 %v1461_v10, %v733_v55  ;;  %v2170_v42 = vld [vmem:[#allocation6_spill] sm:$0xff] }
 0x15f   : > { %v735_v61 = vmul.f32 %v2003_v38, %v719_v58  ;;  %v456_v11 = vmul.f32 0.5, %v1786_v7  ;;  %v871_v52 = vmul.f32 %v855_v59, %v455_v17  ;;  %v858_v9 = vadd.f32 1.0, %v842_v23 }
 0x160   : > { %v702_v57 = vmul.f32 %v2020_v6, %v686_v0  ;;  %v844_v29 = vmul.f32 %v828_v36, %v1928_v13  ;;  %v857_v50 = vadd.f32 1.0, %v841_v24  ;;  %v843_v16 = vmul.f32 %v827_v53, %v1840_v51 }
 0x161   : > { %1319 = vmatmul.mubr.msk.f32.gmra.mrb[2].mxu1 %vm895_vm12, %v869_v1  ;;  %v872_v18 = vmul.f32 %v856_v41, %v456_v11  ;;  %v829_v31 = vsub.f32 1.0, %v813_v19  ;;  %v458_v7 = vmul.f32 0.5, %v1852_v34  ;;  %v457_v20 = vmul.f32 0.5, %v1776_v54 }
 0x162   : > { %v1463_v37 = vpop.eup %1462  ;;  %v718_v40 = vadd.f32 0.2548296, %v702_v57  ;;  %1321 = vmatprep.mubr.msk.f32.mxu1 %vm895_vm12, %v870_v4  ;;  %v860_v44 = vadd.f32 1.0, %v844_v29  ;;  %v859_v8 = vadd.f32 1.0, %v843_v16  ;;  %v460_v49 = vmul.f32 0.5, %v1901_v63  ;;  %v2169_v63 = vld [vmem:[#allocation5_spill] sm:$0xff] }
 0x163   : > { %v815_v38 = vmul.f32 %v1463_v37, %v735_v61  ;;  %v874_v15 = vmul.f32 %v858_v9, %v458_v7  ;;  %v873_v22 = vmul.f32 %v857_v50, %v457_v20  ;;  %v845_v51 = vmul.f32 %v829_v31, %v1905_v48  ;;  %v2168_v48 = vld [vmem:[#allocation7_spill] sm:$0xff] }
 0x164   : > { %v734_v46 = vmul.f32 %v2020_v6, %v718_v40  ;;  %v459_v6 = vmul.f32 0.5, %v1813_v60  ;;  %v876_v54 = vmul.f32 %v860_v44, %v460_v49  ;;  %v462_v30 = vmul.f32 0.5, %v2168_v48 }
 0x165   : > { %v1465_v3 = vpop.eup %1464  ;;  %1322 = vmatmul.mubr.msk.f32.gmra.mrb[4].mxu1 %vm895_vm12, %v871_v52  ;;  %v831_v43 = vsub.f32 1.0, %v815_v38  ;;  %v861_v5 = vadd.f32 1.0, %v845_v51  ;;  %v461_v47 = vmul.f32 0.5, %v2169_v63  ;;  %v463_v35 = vmul.f32 0.5, %v2170_v42 }
 0x166   : > { %v814_v13 = vmul.f32 %v1465_v3, %v734_v46  ;;  %1324 = vmatprep.mubr.msk.f32.mxu1 %vm895_vm12, %v872_v18  ;;  %v875_v62 = vmul.f32 %v859_v8, %v459_v6 }
 0x167   : > { %v847_v39 = vmul.f32 %v831_v43, %v1940_v25  ;;  %v877_v32 = vmul.f32 %v861_v5, %v461_v47  ;;  %v1206_v25 = vld [vmem:[%s2158_s4] ss:$0 sm:$0xff] }
 0x168   : > { %v830_v34 = vsub.f32 1.0, %v814_v13 }
 0x169   : > { %1325 = vmatmul.mubr.msk.f32.gmra.mrb[6].mxu1 %vm895_vm12, %v873_v22 }
 0x16a   : > { %v846_v28 = vmul.f32 %v830_v34, %v1969_v33  ;;  %1327 = vmatprep.mubr.msk.f32.mxu1 %vm895_vm12, %v874_v15  ;;  %v863_v33 = vadd.f32 1.0, %v847_v39 }
 0x16c   : > { %v862_v26 = vadd.f32 1.0, %v846_v28  ;;  %v879_v56 = vmul.f32 %v863_v33, %v463_v35 }
 0x16d   : > { %1328 = vmatmul.mubr.msk.f32.gmra.mrb[8].mxu1 %vm895_vm12, %v875_v62 }
 0x16e   : > { %v878_v60 = vmul.f32 %v862_v26, %v462_v30  ;;  %1330 = vmatprep.mubr.msk.f32.mxu1 %vm895_vm12, %v876_v54 }
 0x171   : > { %1331 = vmatmul.mubr.msk.f32.gmra.mrb[10].mxu1 %vm895_vm12, %v877_v32 }
 0x172   : > { %1333 = vmatprep.mubr.msk.f32.mxu1 %vm895_vm12, %v878_v60 }
 0x175   : > { %1334 = vmatmul.mubr.msk.f32.gmra.mrb[12].mxu1 %vm895_vm12, %v879_v56 }
 0x1f9   : > { %v1314_v45 = vpop.f32.mrb[16].mxu0 }
 0x1fa   : > { %v1016_v12 = vadd.f32 %v1314_v45, %v1206_v25  ;;  %v1010_v14 = vpop.f32.mrb[17].mxu0 }
 0x1fb   : > { %v1011_v21 = vadd.f32 %v1206_v25, %v1010_v14 }
 0x1fc   : > { %1090 = vst [vmem:[%s2084_s23 + $0x8] sm:$0xff] %v1016_v12 }
 0x1fd   : > { %1089 = vst [vmem:[%s2084_s23] sm:$0xff] %v1011_v21 }
 0x230   : > { %v1317_v27 = vpop.f32.mrb[0].mxu1 }
 0x231   : > { %v1026_v55 = vadd.f32 %v1317_v27, %v1206_v25  ;;  %v1020_v58 = vpop.f32.mrb[1].mxu1 }
 0x232   : > { %v1021_v10 = vadd.f32 %v1206_v25, %v1020_v58 }
 0x233   : > { %1092 = vst [vmem:[%s2084_s23 + $0x18] sm:$0xff] %v1026_v55 }
 0x234   : > { %1091 = vst [vmem:[%s2084_s23 + $0x10] sm:$0xff] %v1021_v10  ;;  %v1320_v2 = vpop.f32.mrb[2].mxu1 }
 0x235   : > { %v1036_v1 = vadd.f32 %v1320_v2, %v1206_v25  ;;  %v1030_v17 = vpop.f32.mrb[3].mxu1 }
 0x236   : > { %v1031_v59 = vadd.f32 %v1206_v25, %v1030_v17 }
 0x237   : > { %1094 = vst [vmem:[%s2084_s23 + $0x28] sm:$0xff] %v1036_v1 }
 0x238   : > { %1093 = vst [vmem:[%s2084_s23 + $0x20] sm:$0xff] %v1031_v59  ;;  %v1323_v4 = vpop.f32.mrb[4].mxu1 }
 0x239   : > { %v1046_v41 = vadd.f32 %v1323_v4, %v1206_v25  ;;  %v1040_v23 = vpop.f32.mrb[5].mxu1 }
 0x23a   : > { %v1041_v36 = vadd.f32 %v1206_v25, %v1040_v23 }
 0x23b   : > { %1096 = vst [vmem:[%s2084_s23 + $0x38] sm:$0xff] %v1046_v41 }
 0x23c   : > { %1095 = vst [vmem:[%s2084_s23 + $0x30] sm:$0xff] %v1041_v36  ;;  %v1326_v0 = vpop.f32.mrb[6].mxu1 }
 0x23d   : > { %v1056_v24 = vadd.f32 %v1326_v0, %v1206_v25  ;;  %v1050_v53 = vpop.f32.mrb[7].mxu1 }
 0x23e   : > { %v1051_v19 = vadd.f32 %v1206_v25, %v1050_v53 }
 0x23f   : > { %1098 = vst [vmem:[%s2084_s23 + $0x48] sm:$0xff] %v1056_v24 }
 0x240   : > { %1097 = vst [vmem:[%s2084_s23 + $0x40] sm:$0xff] %v1051_v19  ;;  %v1329_v61 = vpop.f32.mrb[8].mxu1 }
 0x241   : > { %v1066_v11 = vadd.f32 %v1329_v61, %v1206_v25  ;;  %v1060_v57 = vpop.f32.mrb[9].mxu1 }
 0x242   : > { %v1061_v52 = vadd.f32 %v1206_v25, %v1060_v57 }
 0x243   : > { %1100 = vst [vmem:[%s2084_s23 + $0x58] sm:$0xff] %v1066_v11 }
 0x244   : > { %1099 = vst [vmem:[%s2084_s23 + $0x50] sm:$0xff] %v1061_v52  ;;  %v1332_v37 = vpop.f32.mrb[10].mxu1 }
 0x245   : > { %v1076_v18 = vadd.f32 %v1332_v37, %v1206_v25  ;;  %v1070_v9 = vpop.f32.mrb[11].mxu1 }
 0x246   : > { %v1071_v29 = vadd.f32 %v1206_v25, %v1070_v9 }
 0x247   : > { %1102 = vst [vmem:[%s2084_s23 + $0x68] sm:$0xff] %v1076_v18 }
 0x248   : > { %1101 = vst [vmem:[%s2084_s23 + $0x60] sm:$0xff] %v1071_v29  ;;  %v1335_v40 = vpop.f32.mrb[12].mxu1 }
 0x249   : > { %v1086_v50 = vadd.f32 %v1335_v40, %v1206_v25  ;;  %v1080_v16 = vpop.f32.mrb[13].mxu1 }
 0x24a   : > { %v1081_v31 = vadd.f32 %v1206_v25, %v1080_v16 }
 0x24b   : > { %1104 = vst [vmem:[%s2084_s23 + $0x78] sm:$0xff] %v1086_v50 }
 0x24c   : > { %1103 = vst [vmem:[%s2084_s23 + $0x70] sm:$0xff] %v1081_v31 }
 0x24d   : > { %1479 = shalt.err (!%p1476_p3)
}
 0x24e   : > { %s1480_s12 = scalar_lea.hbm %s2105_s7, 2048  ;;  %s1484_s15 = scalar_lea.hbm %s2159_s5, 4096 }
 0x24f   : > { %p1481_p4 = scmp.ne.s32.totalorder %s2105_s7, %s1480_s12  ;;  %p1485_p9 = scmp.lt.u32.totalorder %s2105_s7, %s2159_s5 }
 0x250   : > { %p1486_p10 = scmp.lt.u32.totalorder %s1484_s15, %s1480_s12  ;;  %p1488_p12 = scmp.lt.u32.totalorder %s1480_s12, %s2105_s7 }
 0x251   : > { %p1482_p7 = pnand %p1481_p4, %p1602_p5 }
 0x252   : > { %p1487_p11 = por %p1486_p10, %p1485_p9 }
 0x253   : > { %p1483_p8 = pneg %p1482_p7 }
 0x254   : > { %p1489_p13 = por %p1488_p12, %p1487_p11 }
 0x256   : > { %p1490_p0 = pnand %p1489_p13, %p1483_p8 }
 0x258   : > { %1493 = shalt.err (!%p1490_p0)
}
 0x259   : > { %s1532_s23 = smov 128   ;;  %s1533_s25 = smov 8  }
 0x25a   : > { %1360 = dma.vmem_to_hbm [thread:$0]  (%p1602_p5), %s2107_s26, 2048, %s2105_s7, %s2113_s22, %s1532_s23, %s1532_s23, %s1533_s25  }
 0x25b PF: > { %p1366_p1 = scmp.ge.s32.totalorder %s1528_s21, 2  ;;  %s1134_s30 = sand.u32 1, %s1516_s18  }
 0x25c   : > { %s1135_s6 = scalar_lea.sflag [#allocation3], %s1134_s30 }
 0x25d   : > { %p1363_p2 = pnand %p1366_p1, %p1606_p6 }
 0x25f   : > { %1511 = dma.done.wait (!%p1363_p2), %s1135_s6, 2048  }
 0x260   : > { %1513 = vsyncadd (!%p1363_p2), %s1135_s6, 4294965248  ;;  %p15_p3 = scmp.ge.s32.totalorder %s1589_s24, 4   ;;  %s2171_s18 = smov %s1520_s19 }
 0x261   : > { %s2172_s19 = smov %s1524_s20  ;;  %s2173_s20 = smov %s1600_s27 }
 0x262   : > { %s2174_s21 = smov %s1589_s24  ;;  %17 = sbr.rel (!%p15_p3) target bundleno = 3 (0x3), region = 75 }
 0x269   :  { %1140 = vsyncpa [#allocation3], 1 }
 0x26a   :  { %1142 = vsyncpa [#allocation3 + $0x1], 1 }

</bundles_post_ra>
